<compile_context>
chip_gen: v7x
topology: tpu7x:2x2x1
jax: 0.10.0
libtpu: 0.0.40
codegen_flags: <defaults>
</compile_context>

<pallas_src>
import functools

import jax
import jax.numpy as jnp
from jax.experimental import pallas as pl
from jax.experimental.pallas import tpu as pltpu


def _round_up(x: int, m: int) -> int:
    return ((x + m - 1) // m) * m


def _cdiv(a: int, b: int) -> int:
    return (a + b - 1) // b


def _sublane(dtype) -> int:
    # Minimum second-to-last tile dim: 8 for 4-byte, 16 for 2-byte, 32 for 1-byte dtypes.
    return max(8, 32 // jnp.dtype(dtype).itemsize)


def _vmem_budget_bytes() -> int:
    """Generation-aware scoped-VMEM budget for this kernel."""
    cap = 64 * 1024 * 1024
    try:
        info = pltpu.get_tpu_info()
        cap = int(getattr(info, "vmem_capacity_bytes", cap) or cap)
    except Exception:  # no devices / unknown chip: stay conservative
        pass
    if cap >= 100 * 1024 * 1024:       # v5e / v6e: 128 MiB physical VMEM
        return 96 * 1024 * 1024
    return 44 * 1024 * 1024            # v7x: 64 MiB physical, leave pipelining headroom


# --------------------------------------------------------------------------------------
# Kernels
# --------------------------------------------------------------------------------------
def _linear_resident_kernel(x_ref, w_ref, b_ref, o_ref):
    """Fast path: weight [Kp, Np] stays VMEM-resident (constant index_map); grid over M."""
    o_ref[...] = (
        jnp.dot(x_ref[...], w_ref[...], preferred_element_type=jnp.float32)
        + b_ref[...].astype(jnp.float32)
    ).astype(o_ref.dtype)


def _linear_tiled_kernel(x_ref, w_ref, b_ref, o_ref, acc_ref):
    """General path: one (i, j, k) grid step with canonical [tm,tk] @ [tk,tn] contraction."""
    k = pl.program_id(2)
    contrib = jnp.dot(x_ref[...], w_ref[...], preferred_element_type=jnp.float32)

    @pl.when(k == 0)
    def _():
        acc_ref[...] = contrib            # direct write: no zero-fill + add pass

    @pl.when(k > 0)
    def _():
        acc_ref[...] += contrib

    @pl.when(k == pl.num_programs(2) - 1)
    def _():
        o_ref[...] = (acc_ref[...] + b_ref[...].astype(jnp.float32)).astype(o_ref.dtype)


# --------------------------------------------------------------------------------------
# Jitted implementations
# --------------------------------------------------------------------------------------
@functools.partial(jax.jit, static_argnames=("tm", "vmem_limit"))
def _forward_resident(x, weight, bias, *, tm, vmem_limit):
    B, K = x.shape
    N, _ = weight.shape
    itemsize = jnp.dtype(x.dtype).itemsize

    Bp = _round_up(B, tm)
    Kp = _round_up(K, 128)
    Np = _round_up(N, 128)

    x_p = x if (Bp, Kp) == (B, K) else jnp.pad(x, ((0, Bp - B), (0, Kp - K)))
    w_p = weight if (Np, Kp) == (N, K) else jnp.pad(weight, ((0, Np - N), (0, Kp - K)))
    w_t = w_p.T                                    # one-time [Kp, Np] transpose in HBM
    b2 = (bias if Np == N else jnp.pad(bias, (0, Np - N))).reshape(1, Np)

    grid = (Bp // tm,)
    out_p = pl.pallas_call(
        _linear_resident_kernel,
        out_shape=jax.ShapeDtypeStruct((Bp, Np), x.dtype),
        grid_spec=pltpu.PrefetchScalarGridSpec(
            num_scalar_prefetch=0,
            grid=grid,
            in_specs=[
                pl.BlockSpec((tm, Kp), lambda i: (i, 0)),   # x streamed once
                pl.BlockSpec((Kp, Np), lambda i: (0, 0)),   # weight resident (DMA'd once)
                pl.BlockSpec((1, Np), lambda i: (0, 0)),    # bias resident
            ],
            out_specs=pl.BlockSpec((tm, Np), lambda i: (i, 0)),
        ),
        compiler_params=pltpu.CompilerParams(
            dimension_semantics=("parallel",),
            vmem_limit_bytes=vmem_limit,
        ),
        cost_estimate=pl.CostEstimate(
            flops=2 * Bp * Kp * Np,
            transcendentals=0,
            bytes_accessed=(Bp * Kp + Kp * Np + Np + Bp * Np) * itemsize,
        ),
    )(x_p, w_t, b2)

    if (Bp, Np) != (B, N):
        out_p = out_p[:B, :N]
    return out_p


@functools.partial(jax.jit, static_argnames=("tm", "tn", "tk", "vmem_limit"))
def _forward_tiled(x, weight, bias, *, tm, tn, tk, vmem_limit):
    B, K = x.shape
    N, _ = weight.shape
    itemsize = jnp.dtype(x.dtype).itemsize

    Bp, Kp, Np = _round_up(B, tm), _round_up(K, tk), _round_up(N, tn)

    # Zero-padding K is required for contraction correctness; M/N padding keeps output
    # stores lane-dense and is skipped when shapes already align with the tiles.
    x_p = x if (Bp, Kp) == (B, K) else jnp.pad(x, ((0, Bp - B), (0, Kp - K)))
    w_p = weight if (Np, Kp) == (N, K) else jnp.pad(weight, ((0, Np - N), (0, Kp - K)))
    w_t = w_p.T                                    # one-time [Kp, Np] transpose in HBM
    b2 = (bias if Np == N else jnp.pad(bias, (0, Np - N))).reshape(1, Np)

    grid = (Bp // tm, Np // tn, Kp // tk)
    # Realistic streamed bytes: x is re-read per N block, weight per M block.
    bytes_accessed = (
        Bp * Kp * itemsize * (Np // tn)
        + Kp * Np * itemsize * (Bp // tm)
        + Np * itemsize
        + Bp * Np * itemsize
    )

    out_p = pl.pallas_call(
        _linear_tiled_kernel,
        out_shape=jax.ShapeDtypeStruct((Bp, Np), x.dtype),
        grid_spec=pltpu.PrefetchScalarGridSpec(
            num_scalar_prefetch=0,
            grid=grid,
            in_specs=[
                pl.BlockSpec((tm, tk), lambda i, j, k: (i, k)),   # x tile
                pl.BlockSpec((tk, tn), lambda i, j, k: (k, j)),   # weight tile [K, N] layout
                pl.BlockSpec((1, tn), lambda i, j, k: (0, j)),    # bias tile (N-only)
            ],
            out_specs=pl.BlockSpec((tm, tn), lambda i, j, k: (i, j)),
            scratch_shapes=[pltpu.VMEM((tm, tn), jnp.float32)],
        ),
        compiler_params=pltpu.CompilerParams(
            dimension_semantics=("parallel", "parallel", "arbitrary"),
            vmem_limit_bytes=vmem_limit,
        ),
        cost_estimate=pl.CostEstimate(
            flops=2 * Bp * Kp * Np, transcendentals=0, bytes_accessed=bytes_accessed
        ),
    )(x_p, w_t, b2)

    if (Bp, Np) != (B, N):
        out_p = out_p[:B, :N]
    return out_p


# --------------------------------------------------------------------------------------
# Public wrapper (shape-static planning on the host, then dispatch to a jitted impl)
# --------------------------------------------------------------------------------------
def inner_deconf_forward(x, weight, bias, *, tm=None, tn=None, tk=None,
                         use_resident_weight=None, compute_dtype=None):
    """Equivalent of InnerDeconf.forward: y = x @ W^T + b.

    x:      [B, in_features]
    weight: [num_classes, in_features]   (PyTorch Linear layout)
    bias:   [num_classes]
    compute_dtype: optionally cast x/weight (e.g. jnp.bfloat16) for MXU-peak throughput;
                   the f32 accumulator is kept and the result is cast back to x.dtype.
    """
    out_dtype = x.dtype
    if compute_dtype is not None:
        x = x.astype(compute_dtype)
        weight = weight.astype(compute_dtype)

    B, K = x.shape
    N, K_w = weight.shape
    assert K == K_w, "in_features mismatch between x and weight"

    budget = _vmem_budget_bytes()
    sub = _sublane(x.dtype)
    itemsize = jnp.dtype(x.dtype).itemsize

    # ----- resident-weight fast path (typical small classifier head) -----
    Kp128, Np128 = _round_up(K, 128), _round_up(N, 128)
    tm_fast = _round_up(min(tm or 512, _round_up(B, sub)), sub)
    if _cdiv(B, tm_fast) < 2 and B >= 2 * sub:
        # keep both v7x TensorCores busy when the batch allows it
        tm_fast = _round_up(_cdiv(B, 2), sub)
    fast_bytes = (
        2 * Kp128 * Np128 * itemsize      # weight buffers (worst case)
        + 2 * tm_fast * Kp128 * itemsize  # double-buffered x tiles
        + 2 * tm_fast * Np128 * itemsize  # double-buffered out tiles
        + Np128 * itemsize                # bias
    )
    if use_resident_weight is None:
        use_resident_weight = fast_bytes <= int(0.7 * budget)

    if use_resident_weight:
        out = _forward_resident(x, weight, bias, tm=tm_fast, vmem_limit=budget)
        return out.astype(out_dtype) if out.dtype != out_dtype else out

    # ----- general tiled (M, N, K) path -----
    if budget >= 80 * 1024 * 1024:        # v5e / v6e: plenty of VMEM -> bigger tiles
        dm, dn, dk = 512, 768, 1024
    else:                                 # v7x: 64 MiB physical -> slightly tighter tiles
        dm, dn, dk = 512, 512, 1024
    tm, tn, tk = tm or dm, tn or dn, tk or dk
    tm = _round_up(min(tm, _round_up(B, sub)), sub)
    tn = _round_up(min(tn, _round_up(N, 128)), 128)
    tk = _round_up(min(tk, _round_up(K, 128)), 128)
    if _cdiv(N, tn) == 1 and _cdiv(B, tm) < 2 and B >= 2 * sub:
        tm = _round_up(_cdiv(B, 2), sub)  # guarantee >= 2 parallel iterations on v7x

    out = _forward_tiled(x, weight, bias, tm=tm, tn=tn, tk=tk, vmem_limit=budget)
    return out.astype(out_dtype) if out.dtype != out_dtype else out


def init_inner_deconf_params(key, in_features, num_classes, dtype=jnp.float32):
    # Matches InnerDeconf._init_weights:
    #   kaiming_normal_(weight, nonlinearity='relu') -> std = sqrt(2 / fan_in)
    #   bias = zeros
    std = (2.0 / in_features) ** 0.5
    weight = jax.random.normal(key, (num_classes, in_features), dtype=dtype) * std
    bias = jnp.zeros((num_classes,), dtype=dtype)
    return weight, bias


if __name__ == "__main__":
    key = jax.random.PRNGKey(0)
    kx, kw, kx2, kw2, kx3, kw3 = jax.random.split(key, 6)

    # Case 1: the module's natural small shapes -> resident-weight fast path.
    B, in_features, num_classes = 8, 32, 16
    x = jax.random.normal(kx, (B, in_features), dtype=jnp.float32)
    weight, bias = init_inner_deconf_params(kw, in_features, num_classes)
    out = inner_deconf_forward(x, weight, bias)
    jax.block_until_ready(out)
    ref = x @ weight.T + bias
    assert out.shape == (B, num_classes)
    assert jnp.allclose(out, ref, atol=1e-5, rtol=1e-5)

    # Case 2: multi-block resident path (grid over M with the weight kept VMEM-resident).
    B3, K3, N3 = 40, 32, 16
    x3 = jax.random.normal(kx3, (B3, K3), dtype=jnp.float32)
    w3, b3 = init_inner_deconf_params(kw3, K3, N3)
    out3 = inner_deconf_forward(x3, w3, b3)
    jax.block_until_ready(out3)
    ref3 = x3 @ w3.T + b3
    assert out3.shape == (B3, N3)
    assert jnp.allclose(out3, ref3, atol=1e-5, rtol=1e-5)

    # Case 3: force the general (M, N, K) accumulator path with small tiles + ragged dims.
    B2, K2, N2 = 48, 384, 320
    x2 = jax.random.normal(kx2, (B2, K2), dtype=jnp.float32)
    w2, b2 = init_inner_deconf_params(kw2, K2, N2)
    out2 = inner_deconf_forward(x2, w2, b2, tm=16, tn=128, tk=128,
                                use_resident_weight=False)   # grid = (3, 3, 3)
    jax.block_until_ready(out2)
    ref2 = x2 @ w2.T + b2
    assert out2.shape == (B2, N2)
    assert jnp.allclose(out2, ref2, atol=1e-4, rtol=1e-4)

    print("KERNEL_OK")
</pallas_src>

<mosaic_0001>
module attributes {stable_mosaic.version = 11 : i64} {
  func.func @_linear_resident_kernel(%arg0: i32, %arg1: memref<8x128xf32, #tpu.memory_space<vmem>>, %arg2: memref<128x128xf32, #tpu.memory_space<vmem>>, %arg3: memref<1x128xf32, #tpu.memory_space<vmem>>, %arg4: memref<8x128xf32, #tpu.memory_space<vmem>>) attributes {dimension_semantics = [#tpu.dimension_semantics<parallel>], iteration_bounds = array<i64: 1>, scalar_prefetch = 0 : i64, scratch_operands = 0 : i64, tpu.core_type = #tpu.core_type<tc>, window_params = [{transform_indices = @transform_0, window_bounds = array<i64: 8, 128>}, {pipeline_mode = #tpu.pipeline_mode<synchronous>, transform_indices = @transform_1, window_bounds = array<i64: 128, 128>}, {pipeline_mode = #tpu.pipeline_mode<synchronous>, transform_indices = @transform_2, window_bounds = array<i64: 1, 128>}, {transform_indices = @transform_3, window_bounds = array<i64: 8, 128>}]} {
    %c0 = arith.constant 0 : index
    %c0_0 = arith.constant 0 : index
    %0 = vector.load %arg1[%c0, %c0_0] : memref<8x128xf32, #tpu.memory_space<vmem>>, vector<8x128xf32>
    %c0_1 = arith.constant 0 : index
    %c0_2 = arith.constant 0 : index
    %1 = vector.load %arg2[%c0_1, %c0_2] : memref<128x128xf32, #tpu.memory_space<vmem>>, vector<128x128xf32>
    %cst = arith.constant dense<0.000000e+00> : vector<8x128xf32>
    %2 = tpu.matmul %0, %1, %cst {dimension_numbers = #tpu.dot_dimension_numbers<[1], [0], [0], [1], [0, 0, 1, 1], [], []>} : vector<8x128xf32>, vector<128x128xf32>, vector<8x128xf32> -> vector<8x128xf32>
    %c0_3 = arith.constant 0 : index
    %c0_4 = arith.constant 0 : index
    %3 = vector.load %arg3[%c0_3, %c0_4] : memref<1x128xf32, #tpu.memory_space<vmem>>, vector<1x128xf32>
    %4 = vector.broadcast %3 : vector<1x128xf32> to vector<8x128xf32>
    %5 = arith.addf %2, %4 : vector<8x128xf32>
    %c0_5 = arith.constant 0 : index
    %c0_6 = arith.constant 0 : index
    %6 = vector.load %arg4[%c0_5, %c0_6] : memref<8x128xf32, #tpu.memory_space<vmem>>, vector<8x128xf32>
    tpu.vector_store %arg4[%c0_5, %c0_6], %5 {strides = array<i32>} : memref<8x128xf32, #tpu.memory_space<vmem>>, vector<8x128xf32>,
    return
  }
  func.func @transform_0(%arg0: i32) -> (i32, i32) {
    %c0_i32 = arith.constant 0 : i32
    %c0_i32_0 = arith.constant 0 : i32
    return %arg0, %c0_i32 : i32, i32
  }
  func.func @transform_1(%arg0: i32) -> (i32, i32) {
    %c0_i32 = arith.constant 0 : i32
    %c0_i32_0 = arith.constant 0 : i32
    %c0_i32_1 = arith.constant 0 : i32
    return %c0_i32, %c0_i32_0 : i32, i32
  }
  func.func @transform_2(%arg0: i32) -> (i32, i32) {
    %c0_i32 = arith.constant 0 : i32
    %c0_i32_0 = arith.constant 0 : i32
    %c0_i32_1 = arith.constant 0 : i32
    return %c0_i32, %c0_i32_0 : i32, i32
  }
  func.func @transform_3(%arg0: i32) -> (i32, i32) {
    %c0_i32 = arith.constant 0 : i32
    %c0_i32_0 = arith.constant 0 : i32
    return %arg0, %c0_i32 : i32, i32
  }
}

</mosaic_0001>

<bundles_post_ra>
// kernel: _forward_resident.1
= control target key start
LH: loop header
LB: loop body
LE: loop exit
PB: predicated region body
PF: predicated region fallthrough
CT: control target
= control target key end

     0   :  { %v229_v3 = vmov 0.0|0.0   ;;  %vm230_vm0 = vmmov 0   ;;  %v231_v6 = vmov 0.0   ;;  %s319_s0 = inlined_call_operand.vmem [shape: f32[8,128], index: 0, kind: input, shape index: {}]   ;;  %s320_s1 = inlined_call_operand.vmem [shape: f32[128,128], index: 1, kind: input, shape index: {}]   ;;  %s321_s2 = inlined_call_operand.vmem [shape: f32[1,128], index: 2, kind: input, shape index: {}]   ;;  %s322_s3 = inlined_call_operand.hbm [shape: f32[8,128], index: 3, kind: output, shape index: {}]  }
   0x1   :  { %v16_v0 = vld [vmem:[%s320_s1] sm:$0xff]  ;;  %v17_v1 = vld [vmem:[%s320_s1 + $0x8] sm:$0xff]  ;;  %v18_v2 = vld [vmem:[%s320_s1 + $0x10] sm:$0xff]  ;;  %177 = vmatprep.subr.bf16.mxu0 %v229_v3  ;;  %174 = vmatprep.mubr.msk.f32.mxu0 %vm230_vm0, %v231_v6 }
   0x2   :  { %v178_v4 = vpack.c.bf16 %v17_v1, %v16_v0  ;;  %v19_v5 = vld [vmem:[%s320_s1 + $0x18] sm:$0xff]  ;;  %v20_v8 = vld [vmem:[%s320_s1 + $0x20] sm:$0xff]  ;;  %v21_v9 = vld [vmem:[%s320_s1 + $0x28] sm:$0xff] }
   0x3   :  { %v181_v7 = vpack.c.bf16 %v19_v5, %v18_v2 }
   0x4   :  { %179 = vmatpush3.bf16.msra.mxu0 %v178_v4 }
   0x5   :  { %180 = vmatprep.subr.bf16.mxu0 %v229_v3 }
   0x6   :  { %8 = vsyncpa [#allocation3], 0  ;;  %v184_v10 = vpack.c.bf16 %v21_v9, %v20_v8  ;;  %v22_v11 = vld [vmem:[%s320_s1 + $0x30] sm:$0xff]  ;;  %v23_v12 = vld [vmem:[%s320_s1 + $0x38] sm:$0xff]  ;;  %s232_s21 = smov [#allocation2]  }
   0x7   :  { %v187_v13 = vpack.c.bf16 %v23_v12, %v22_v11  ;;  %v24_v14 = vld [vmem:[%s320_s1 + $0x40] sm:$0xff]  ;;  %v25_v15 = vld [vmem:[%s320_s1 + $0x48] sm:$0xff]  ;;  %v26_v17 = vld [vmem:[%s320_s1 + $0x50] sm:$0xff]  ;;  %s116_s22 = sshll.u32 %s232_s21, 4  ;;  %s117_s22 = int_to_ptr.vmem [resolvable:$true] %s116_s22 }
   0x8   :  { %182 = vmatpush3.bf16.msra.mxu0 %v181_v7  ;;  %v190_v16 = vpack.c.bf16 %v25_v15, %v24_v14  ;;  %v27_v18 = vld [vmem:[%s320_s1 + $0x58] sm:$0xff]  ;;  %v28_v20 = vld [vmem:[%s320_s1 + $0x60] sm:$0xff]  ;;  %v29_v21 = vld [vmem:[%s320_s1 + $0x68] sm:$0xff]  ;;  %p210_p1 = scmp.lt.s32.totalorder %s117_s22, %s117_s22 }
   0x9   :  { %183 = vmatprep.subr.bf16.mxu0 %v229_v3  ;;  %v193_v19 = vpack.c.bf16 %v27_v18, %v26_v17  ;;  %v196_v22 = vpack.c.bf16 %v29_v21, %v28_v20  ;;  %v30_v23 = vld [vmem:[%s320_s1 + $0x70] sm:$0xff]  ;;  %v31_v24 = vld [vmem:[%s320_s1 + $0x78] sm:$0xff]  ;;  %v15_v26 = vld [vmem:[%s319_s0] sm:$0xff]  ;;  %s205_s1 = scalar_lea.vmem %s117_s22, 128 }
   0xa   :  { %v199_v25 = vpack.c.bf16 %v31_v24, %v30_v23  ;;  %v124_v27 = vld [vmem:[%s321_s2] ss:$0 sm:$0xff]  ;;  %p206_p0 = scmp.ne.s32.totalorder %s117_s22, %s205_s1  ;;  %p211_p2 = scmp.lt.s32.totalorder %s205_s1, %s205_s1 }
   0xc   :  { %185 = vmatpush3.bf16.msra.mxu0 %v184_v10  ;;  %p212_p3 = por %p211_p2, %p210_p1 }
   0xd   :  { %186 = vmatprep.subr.bf16.mxu0 %v229_v3 }
   0xe   :  { %p213_p4 = pnand %p212_p3, %p206_p0 }
  0x10   :  { %188 = vmatpush3.bf16.msra.mxu0 %v187_v13 }
  0x11   :  { %189 = vmatprep.subr.bf16.mxu0 %v229_v3 }
  0x14   :  { %191 = vmatpush3.bf16.msra.mxu0 %v190_v16 }
  0x15   :  { %192 = vmatprep.subr.bf16.mxu0 %v229_v3 }
  0x18   :  { %194 = vmatpush3.bf16.msra.mxu0 %v193_v19 }
  0x19   :  { %195 = vmatprep.subr.bf16.mxu0 %v229_v3 }
  0x1c   :  { %197 = vmatpush3.bf16.msra.mxu0 %v196_v22 }
  0x1d   :  { %198 = vmatprep.subr.bf16.mxu0 %v229_v3 }
  0x20   :  { %200 = vmatpush3.bf16.msra.mxu0 %v199_v25 }
  0x23   :  { %175 = vmatmul.mubr.f32.vlgmr.msra.gmra.mrb[0].mxu0 %v15_v26 }
  0xf6   :  { %v105_v28 = vpop.f32.mrb[0].mxu0 }
  0xf7   :  { %v106_v29 = vadd.f32 %v124_v27, %v105_v28  ;;  %v176_v30 = vpop.f32.mrb[1].mxu0 }
  0xf9   :  { %109 = vst [vmem:[#allocation2] sm:$0xff] %v106_v29 }
  0xfa   :  { %216 = shalt.err (!%p213_p4)
}
  0xfb   :  { %s217_s24 = scalar_lea.hbm %s322_s3, 128 }
  0xfc   :  { %p218_p5 = scmp.ne.s32.totalorder %s322_s3, %s217_s24  ;;  %p221_p6 = scmp.lt.u32.totalorder %s217_s24, %s322_s3 }
  0xfe   :  { %p223_p7 = pnand %p221_p6, %p218_p5 }
 0x100   :  { %226 = shalt.err (!%p223_p7)
}
 0x101   :  { %119 = dma.vmem_to_hbm [thread:$0]  %s117_s22, 128, %s322_s3, [#allocation3]  }
 0x102   :  { %227 = dma.done.wait [#allocation3], 128  }
 0x103   :  { %228 = vsyncadd [#allocation3], 4294967168 }
 0x104   :  { %123 = vsyncpa [#allocation3], 1 }

</bundles_post_ra>
